<compile_context>
chip_gen: v5e
topology: v5e:2x2
jax: 0.10.0
libtpu: 0.0.40
codegen_flags: <defaults>
</compile_context>

<pallas_src>
import jax
import jax.numpy as jnp
from jax.experimental import pallas as pl
from jax.experimental.pallas import tpu as pltpu

# ---- static model hyper-parameters (small, consistent with the module) ----
B = 2          # batch
T = 8          # sequence length
D_IN = 32      # linear_dim (input / output feature dim of the block)
P = 32         # proj_dim   (FSMN memory-block channel dim)
LORDER = 4     # left order of the FSMN memory block
LSTRIDE = 1    # left stride (dilation of the depthwise conv)
RORDER = 0     # right order (0 -> no conv_right, matches FSMN-VAD config)
C_LEN = (LORDER - 1) * LSTRIDE  # cache length in frames
PAD_LEN = C_LEN + T             # length of [cache ; h] along time

# ---- lane-padded channel count and weight-slab row layout (8-row aligned) ----
PC = 128                         # padded channel / feature width (one full lane group)
WLIN_OFF = 0                     # rows [0, 32):    W_lin^T  (D_IN, PC)
TAP_OFF = WLIN_OFF + D_IN        # rows [32, 40):   FSMN taps, LORDER rows used (8, PC)
WAFF_OFF = TAP_OFF + 8           # rows [40, 168):  W_aff^T  (PC, PC)
BIAS_OFF = WAFF_OFF + PC         # rows [168, 176): affine bias, row 0 used (8, PC)
NROWS = BIAS_OFF + 8             # 176


def _basic_block_kernel(x_ref, cache_ref, w_ref, out_ref, ncache_ref):
    """Whole batch in one invocation, everything value-resident.

    x_ref:      (B*T, D_IN)       input features (batch/time flattened on sublanes)
    cache_ref:  (B*C_LEN, PC)     FSMN left-context cache, channel-padded to 128 lanes
    w_ref:      (NROWS, PC)       packed weight slab (see row layout above)
    out_ref:    (B*T, PC)         ReLU output, channel-padded (lane-dense store)
    ncache_ref: (B*C_LEN, PC)     updated cache, channel-padded (lane-dense store)
    """
    x = x_ref[...]                                              # (B*T, D_IN)
    cache = cache_ref[...]                                      # (B*C_LEN, PC)

    # Sublane-aligned static slices of the packed weight slab (offsets 0/32/40/168).
    wlin = w_ref[WLIN_OFF:WLIN_OFF + D_IN, :]                   # (D_IN, PC)
    taps = w_ref[TAP_OFF:TAP_OFF + 8, :]                        # (8, PC); row LORDER-1 holds 1 + w_last
    waff = w_ref[WAFF_OFF:WAFF_OFF + PC, :]                     # (PC, PC)
    bias = w_ref[BIAS_OFF:BIAS_OFF + 1, :]                      # (1, PC)

    # Linear (no bias), all batch rows at once: (B*T, D_IN) @ (D_IN, PC).
    h = jnp.dot(x, wlin, preferred_element_type=jnp.float32)    # (B*T, PC)

    # Depthwise FSMN memory block (valid conv, dilation LSTRIDE, groups = channels)
    # plus residual, computed entirely on values.  The residual and the last tap
    # (whose window equals h exactly) are folded into taps[LORDER-1] by the wrapper.
    fsmn_parts = []
    ncache_parts = []
    for b in range(B):                                          # static unroll, B = 2
        h_b = h[b * T:(b + 1) * T, :]                           # (T, PC), tile-aligned slice
        c_b = cache[b * C_LEN:(b + 1) * C_LEN, :]               # (C_LEN, PC)
        padded = jnp.concatenate([c_b, h_b], axis=0)            # (C_LEN + T, PC)

        acc = h_b * taps[LORDER - 1:LORDER, :]                  # folded residual + last tap
        for k in range(LORDER - 1):                             # static unroll
            win = padded[k * LSTRIDE:k * LSTRIDE + T, :]        # (T, PC) value slice
            acc = acc + win * taps[k:k + 1, :]
        fsmn_parts.append(acc)
        ncache_parts.append(padded[PAD_LEN - C_LEN:, :])        # last C_LEN frames

    fsmn = jnp.concatenate(fsmn_parts, axis=0)                  # (B*T, PC)

    # Affine (with bias) + ReLU, fed straight from vregs: (B*T, PC) @ (PC, PC).
    y = jnp.dot(fsmn, waff, preferred_element_type=jnp.float32) + bias
    out_ref[...] = jnp.maximum(y, 0.0).astype(out_ref.dtype)

    ncache_ref[...] = jnp.concatenate(ncache_parts, axis=0).astype(ncache_ref.dtype)


def basic_block_forward(inp, in_cache, w_lin, w_fsmn, w_aff, b_aff):
    """inp: (B, T, D_IN) float32
       in_cache: (B, P, C_LEN, 1)  -- PyTorch FSMN cache layout
       w_lin: (P, D_IN), w_fsmn: (P, 1, LORDER, 1), w_aff: (D_IN, P), b_aff: (D_IN,)
    returns (out (B, T, D_IN), out_cache (B, P, C_LEN, 1))
    """
    # ---- glue: flatten activations, build one packed & lane-padded weight slab ----
    x2d = inp.reshape(B * T, D_IN)                                       # (B*T, D_IN)
    cache2d = jnp.transpose(in_cache[..., 0], (0, 2, 1)).reshape(B * C_LEN, P)
    cache_pad = jnp.pad(cache2d, ((0, 0), (0, PC - P)))                  # (B*C_LEN, PC)

    wlin_t = jnp.transpose(w_lin)                                        # (D_IN, P)
    taps = jnp.transpose(w_fsmn[:, 0, :, 0], (1, 0))                     # (LORDER, P)
    taps_eff = taps.at[LORDER - 1].add(1.0)                              # fold residual
    waff_t = jnp.transpose(w_aff)                                        # (P, D_IN)

    wlin_pad = jnp.pad(wlin_t, ((0, 0), (0, PC - P)))                    # (D_IN, PC)
    taps_pad = jnp.pad(taps_eff, ((0, 8 - LORDER), (0, PC - P)))         # (8, PC)
    waff_pad = jnp.pad(waff_t, ((0, PC - P), (0, PC - D_IN)))            # (PC, PC)
    bias_pad = jnp.pad(b_aff[None, :], ((0, 7), (0, PC - D_IN)))         # (8, PC)
    wslab = jnp.concatenate([wlin_pad, taps_pad, waff_pad, bias_pad], axis=0)  # (NROWS, PC)

    flops = 2 * (B * T) * D_IN * P * 2 + B * T * P * LORDER * 2
    bytes_accessed = 4 * (B * T * D_IN + B * C_LEN * PC + NROWS * PC
                          + B * T * PC + B * C_LEN * PC)

    out_pad, ncache_pad = pl.pallas_call(
        _basic_block_kernel,
        out_shape=(
            jax.ShapeDtypeStruct((B * T, PC), jnp.float32),
            jax.ShapeDtypeStruct((B * C_LEN, PC), jnp.float32),
        ),
        grid_spec=pltpu.PrefetchScalarGridSpec(
            num_scalar_prefetch=0,
            grid=(1,),
            in_specs=[
                pl.BlockSpec((B * T, D_IN), lambda i: (0, 0)),           # x (flattened)
                pl.BlockSpec((B * C_LEN, PC), lambda i: (0, 0)),         # cache (2D, padded)
                pl.BlockSpec((NROWS, PC), lambda i: (0, 0)),             # packed weight slab
            ],
            out_specs=[
                pl.BlockSpec((B * T, PC), lambda i: (0, 0)),
                pl.BlockSpec((B * C_LEN, PC), lambda i: (0, 0)),
            ],
        ),
        compiler_params=pltpu.CompilerParams(
            dimension_semantics=("arbitrary",)),
        cost_estimate=pl.CostEstimate(
            flops=flops, transcendentals=0, bytes_accessed=bytes_accessed),
    )(x2d, cache_pad, wslab)

    out = out_pad[:, :D_IN].reshape(B, T, D_IN)
    ncache = ncache_pad[:, :P].reshape(B, C_LEN, P)
    out_cache = jnp.transpose(ncache, (0, 2, 1))[..., None]              # (B, P, C_LEN, 1)
    return out, out_cache


def _reference_forward(inp, in_cache, w_lin, w_fsmn, w_aff, b_aff):
    """Pure-JAX reference mirroring the PyTorch forward pass."""
    h = jnp.einsum("btd,pd->btp", inp, w_lin)                            # linear, no bias
    cache_btp = jnp.transpose(in_cache[..., 0], (0, 2, 1))               # (B, C_LEN, P)
    padded = jnp.concatenate([cache_btp, h], axis=1)                     # (B, C_LEN+T, P)
    wfsmn_lp = jnp.transpose(w_fsmn[:, 0, :, 0], (1, 0))                 # (LORDER, P)
    conv = jnp.zeros_like(h)
    for k in range(LORDER):
        conv = conv + padded[:, k * LSTRIDE: k * LSTRIDE + T, :] * wfsmn_lp[k][None, None, :]
    fsmn_out = h + conv
    y = jnp.einsum("btp,dp->btd", fsmn_out, w_aff) + b_aff[None, None, :]
    out = jnp.maximum(y, 0.0)
    out_cache = jnp.transpose(padded[:, T:, :], (0, 2, 1))[..., None]
    return out, out_cache


if __name__ == "__main__":
    key = jax.random.PRNGKey(0)
    k1, k2, k3, k4, k5, k6 = jax.random.split(key, 6)

    # deterministic synthetic parameters (shapes follow the PyTorch module __init__)
    w_lin = jax.random.normal(k1, (P, D_IN), jnp.float32) * 0.1            # Linear(D_IN->P, no bias)
    w_fsmn = jax.random.normal(k2, (P, 1, LORDER, 1), jnp.float32) * 0.1   # Conv2d depthwise
    w_aff = jax.random.normal(k3, (D_IN, P), jnp.float32) * 0.1            # Linear(P->D_IN, bias)
    b_aff = jax.random.normal(k4, (D_IN,), jnp.float32) * 0.1

    inp = jax.random.normal(k5, (B, T, D_IN), jnp.float32)
    in_cache = jax.random.normal(k6, (B, P, C_LEN, 1), jnp.float32)

    out, out_cache = basic_block_forward(inp, in_cache, w_lin, w_fsmn, w_aff, b_aff)
    out = jax.block_until_ready(out)
    out_cache = jax.block_until_ready(out_cache)

    ref_out, ref_cache = _reference_forward(inp, in_cache, w_lin, w_fsmn, w_aff, b_aff)
    assert out.shape == (B, T, D_IN) and out_cache.shape == (B, P, C_LEN, 1)
    assert jnp.allclose(out, ref_out, atol=1e-5, rtol=1e-5)
    assert jnp.allclose(out_cache, ref_cache, atol=1e-5, rtol=1e-5)

    print("KERNEL_OK")
</pallas_src>

<mosaic_0001>
module attributes {stable_mosaic.version = 11 : i64} {
  func.func @_basic_block_kernel(%arg0: i32, %arg1: memref<16x32xf32, #tpu.memory_space<vmem>>, %arg2: memref<6x128xf32, #tpu.memory_space<vmem>>, %arg3: memref<176x128xf32, #tpu.memory_space<vmem>>, %arg4: memref<16x128xf32, #tpu.memory_space<vmem>>, %arg5: memref<6x128xf32, #tpu.memory_space<vmem>>) attributes {dimension_semantics = [#tpu.dimension_semantics<arbitrary>], iteration_bounds = array<i64: 1>, scalar_prefetch = 0 : i64, scratch_operands = 0 : i64, tpu.core_type = #tpu.core_type<tc>, window_params = [{pipeline_mode = #tpu.pipeline_mode<synchronous>, transform_indices = @transform_0, window_bounds = array<i64: 16, 32>}, {pipeline_mode = #tpu.pipeline_mode<synchronous>, transform_indices = @transform_1, window_bounds = array<i64: 6, 128>}, {pipeline_mode = #tpu.pipeline_mode<synchronous>, transform_indices = @transform_2, window_bounds = array<i64: 176, 128>}, {pipeline_mode = #tpu.pipeline_mode<synchronous>, transform_indices = @transform_3, window_bounds = array<i64: 16, 128>}, {pipeline_mode = #tpu.pipeline_mode<synchronous>, transform_indices = @transform_4, window_bounds = array<i64: 6, 128>}]} {
    %c0 = arith.constant 0 : index
    %c0_0 = arith.constant 0 : index
    %0 = vector.load %arg1[%c0, %c0_0] : memref<16x32xf32, #tpu.memory_space<vmem>>, vector<16x32xf32>
    %c0_1 = arith.constant 0 : index
    %c0_2 = arith.constant 0 : index
    %1 = vector.load %arg2[%c0_1, %c0_2] : memref<6x128xf32, #tpu.memory_space<vmem>>, vector<6x128xf32>
    %c0_3 = arith.constant 0 : index
    %c0_4 = arith.constant 0 : index
    %2 = vector.load %arg3[%c0_3, %c0_4] : memref<176x128xf32, #tpu.memory_space<vmem>>, vector<32x128xf32>
    %c32 = arith.constant 32 : index
    %c0_5 = arith.constant 0 : index
    %3 = vector.load %arg3[%c32, %c0_5] : memref<176x128xf32, #tpu.memory_space<vmem>>, vector<8x128xf32>
    %c40 = arith.constant 40 : index
    %c0_6 = arith.constant 0 : index
    %4 = vector.load %arg3[%c40, %c0_6] : memref<176x128xf32, #tpu.memory_space<vmem>>, vector<128x128xf32>
    %c168 = arith.constant 168 : index
    %c0_7 = arith.constant 0 : index
    %5 = vector.load %arg3[%c168, %c0_7] : memref<176x128xf32, #tpu.memory_space<vmem>>, vector<1x128xf32>
    %cst = arith.constant dense<0.000000e+00> : vector<16x128xf32>
    %6 = tpu.matmul %0, %2, %cst {dimension_numbers = #tpu.dot_dimension_numbers<[1], [0], [0], [1], [0, 0, 1, 1], [], []>} : vector<16x32xf32>, vector<32x128xf32>, vector<16x128xf32> -> vector<16x128xf32>
    %7 = vector.extract_strided_slice %6 {offsets = [0, 0], sizes = [8, 128], strides = [1, 1]} : vector<16x128xf32> to vector<8x128xf32>
    %8 = vector.extract_strided_slice %1 {offsets = [0, 0], sizes = [3, 128], strides = [1, 1]} : vector<6x128xf32> to vector<3x128xf32>
    %9 = tpu.concatenate %8, %7 in 0 : vector<3x128xf32>, vector<8x128xf32> -> vector<11x128xf32>
    %10 = vector.extract_strided_slice %3 {offsets = [3, 0], sizes = [1, 128], strides = [1, 1]} : vector<8x128xf32> to vector<1x128xf32>
    %11 = vector.broadcast %10 : vector<1x128xf32> to vector<8x128xf32>
    %12 = arith.mulf %7, %11 : vector<8x128xf32>
    %13 = vector.extract_strided_slice %9 {offsets = [0, 0], sizes = [8, 128], strides = [1, 1]} : vector<11x128xf32> to vector<8x128xf32>
    %14 = vector.extract_strided_slice %3 {offsets = [0, 0], sizes = [1, 128], strides = [1, 1]} : vector<8x128xf32> to vector<1x128xf32>
    %15 = vector.broadcast %14 : vector<1x128xf32> to vector<8x128xf32>
    %16 = arith.mulf %13, %15 : vector<8x128xf32>
    %17 = arith.addf %12, %16 : vector<8x128xf32>
    %18 = vector.extract_strided_slice %9 {offsets = [1, 0], sizes = [8, 128], strides = [1, 1]} : vector<11x128xf32> to vector<8x128xf32>
    %19 = vector.extract_strided_slice %3 {offsets = [1, 0], sizes = [1, 128], strides = [1, 1]} : vector<8x128xf32> to vector<1x128xf32>
    %20 = vector.broadcast %19 : vector<1x128xf32> to vector<8x128xf32>
    %21 = arith.mulf %18, %20 : vector<8x128xf32>
    %22 = arith.addf %17, %21 : vector<8x128xf32>
    %23 = vector.extract_strided_slice %9 {offsets = [2, 0], sizes = [8, 128], strides = [1, 1]} : vector<11x128xf32> to vector<8x128xf32>
    %24 = vector.extract_strided_slice %3 {offsets = [2, 0], sizes = [1, 128], strides = [1, 1]} : vector<8x128xf32> to vector<1x128xf32>
    %25 = vector.broadcast %24 : vector<1x128xf32> to vector<8x128xf32>
    %26 = arith.mulf %23, %25 : vector<8x128xf32>
    %27 = arith.addf %22, %26 : vector<8x128xf32>
    %28 = vector.extract_strided_slice %9 {offsets = [8, 0], sizes = [3, 128], strides = [1, 1]} : vector<11x128xf32> to vector<3x128xf32>
    %29 = vector.extract_strided_slice %6 {offsets = [8, 0], sizes = [8, 128], strides = [1, 1]} : vector<16x128xf32> to vector<8x128xf32>
    %30 = vector.extract_strided_slice %1 {offsets = [3, 0], sizes = [3, 128], strides = [1, 1]} : vector<6x128xf32> to vector<3x128xf32>
    %31 = tpu.concatenate %30, %29 in 0 : vector<3x128xf32>, vector<8x128xf32> -> vector<11x128xf32>
    %32 = vector.extract_strided_slice %3 {offsets = [3, 0], sizes = [1, 128], strides = [1, 1]} : vector<8x128xf32> to vector<1x128xf32>
    %33 = vector.broadcast %32 : vector<1x128xf32> to vector<8x128xf32>
    %34 = arith.mulf %29, %33 : vector<8x128xf32>
    %35 = vector.extract_strided_slice %31 {offsets = [0, 0], sizes = [8, 128], strides = [1, 1]} : vector<11x128xf32> to vector<8x128xf32>
    %36 = vector.extract_strided_slice %3 {offsets = [0, 0], sizes = [1, 128], strides = [1, 1]} : vector<8x128xf32> to vector<1x128xf32>
    %37 = vector.broadcast %36 : vector<1x128xf32> to vector<8x128xf32>
    %38 = arith.mulf %35, %37 : vector<8x128xf32>
    %39 = arith.addf %34, %38 : vector<8x128xf32>
    %40 = vector.extract_strided_slice %31 {offsets = [1, 0], sizes = [8, 128], strides = [1, 1]} : vector<11x128xf32> to vector<8x128xf32>
    %41 = vector.extract_strided_slice %3 {offsets = [1, 0], sizes = [1, 128], strides = [1, 1]} : vector<8x128xf32> to vector<1x128xf32>
    %42 = vector.broadcast %41 : vector<1x128xf32> to vector<8x128xf32>
    %43 = arith.mulf %40, %42 : vector<8x128xf32>
    %44 = arith.addf %39, %43 : vector<8x128xf32>
    %45 = vector.extract_strided_slice %31 {offsets = [2, 0], sizes = [8, 128], strides = [1, 1]} : vector<11x128xf32> to vector<8x128xf32>
    %46 = vector.extract_strided_slice %3 {offsets = [2, 0], sizes = [1, 128], strides = [1, 1]} : vector<8x128xf32> to vector<1x128xf32>
    %47 = vector.broadcast %46 : vector<1x128xf32> to vector<8x128xf32>
    %48 = arith.mulf %45, %47 : vector<8x128xf32>
    %49 = arith.addf %44, %48 : vector<8x128xf32>
    %50 = vector.extract_strided_slice %31 {offsets = [8, 0], sizes = [3, 128], strides = [1, 1]} : vector<11x128xf32> to vector<3x128xf32>
    %51 = tpu.concatenate %27, %49 in 0 : vector<8x128xf32>, vector<8x128xf32> -> vector<16x128xf32>
    %cst_8 = arith.constant dense<0.000000e+00> : vector<16x128xf32>
    %52 = tpu.matmul %51, %4, %cst_8 {dimension_numbers = #tpu.dot_dimension_numbers<[1], [0], [0], [1], [0, 0, 1, 1], [], []>} : vector<16x128xf32>, vector<128x128xf32>, vector<16x128xf32> -> vector<16x128xf32>
    %53 = vector.broadcast %5 : vector<1x128xf32> to vector<16x128xf32>
    %54 = arith.addf %52, %53 : vector<16x128xf32>
    %cst_9 = arith.constant 0.000000e+00 : f32
    %55 = vector.broadcast %cst_9 : f32 to vector<16x128xf32>
    %56 = arith.maximumf %54, %55 : vector<16x128xf32>
    %c0_10 = arith.constant 0 : index
    %c0_11 = arith.constant 0 : index
    %57 = vector.load %arg4[%c0_10, %c0_11] : memref<16x128xf32, #tpu.memory_space<vmem>>, vector<16x128xf32>
    tpu.vector_store %arg4[%c0_10, %c0_11], %56 {strides = array<i32>} : memref<16x128xf32, #tpu.memory_space<vmem>>, vector<16x128xf32>,
    %58 = tpu.concatenate %28, %50 in 0 : vector<3x128xf32>, vector<3x128xf32> -> vector<6x128xf32>
    %c0_12 = arith.constant 0 : index
    %c0_13 = arith.constant 0 : index
    %59 = vector.load %arg5[%c0_12, %c0_13] : memref<6x128xf32, #tpu.memory_space<vmem>>, vector<6x128xf32>
    tpu.vector_store %arg5[%c0_12, %c0_13], %58 {strides = array<i32>} : memref<6x128xf32, #tpu.memory_space<vmem>>, vector<6x128xf32>,
    return
  }
  func.func @transform_0(%arg0: i32) -> (i32, i32) {
    %c0_i32 = arith.constant 0 : i32
    %c0_i32_0 = arith.constant 0 : i32
    %c0_i32_1 = arith.constant 0 : i32
    return %c0_i32, %c0_i32_0 : i32, i32
  }
  func.func @transform_1(%arg0: i32) -> (i32, i32) {
    %c0_i32 = arith.constant 0 : i32
    %c0_i32_0 = arith.constant 0 : i32
    %c0_i32_1 = arith.constant 0 : i32
    return %c0_i32, %c0_i32_0 : i32, i32
  }
  func.func @transform_2(%arg0: i32) -> (i32, i32) {
    %c0_i32 = arith.constant 0 : i32
    %c0_i32_0 = arith.constant 0 : i32
    %c0_i32_1 = arith.constant 0 : i32
    return %c0_i32, %c0_i32_0 : i32, i32
  }
  func.func @transform_3(%arg0: i32) -> (i32, i32) {
    %c0_i32 = arith.constant 0 : i32
    %c0_i32_0 = arith.constant 0 : i32
    %c0_i32_1 = arith.constant 0 : i32
    return %c0_i32, %c0_i32_0 : i32, i32
  }
  func.func @transform_4(%arg0: i32) -> (i32, i32) {
    %c0_i32 = arith.constant 0 : i32
    %c0_i32_0 = arith.constant 0 : i32
    %c0_i32_1 = arith.constant 0 : i32
    return %c0_i32, %c0_i32_0 : i32, i32
  }
}

</mosaic_0001>

<bundles_post_ra>
// kernel: tpu_custom_call.1
= control target key start
LH: loop header
LB: loop body
LE: loop exit
PB: predicated region body
PF: predicated region fallthrough
CT: control target
= control target key end

     0   :  { %10 = vsyncpa [#allocation3], 0  ;;  %s465_s0 = inlined_call_operand.hbm [shape: f32[16,32], index: 0, kind: input, shape index: {}]   ;;  %s466_s1 = inlined_call_operand.hbm [shape: f32[6,128], index: 1, kind: input, shape index: {}]   ;;  %s467_s2 = inlined_call_operand.hbm [shape: f32[176,128], index: 2, kind: input, shape index: {}]   ;;  %s468_s3 = inlined_call_operand.hbm [shape: f32[16,128], index: 3, kind: output, shape index: {0}]   ;;  %s469_s4 = inlined_call_operand.hbm [shape: f32[6,128], index: 4, kind: output, shape index: {1}]  }
   0x1   :  { %11 = vsyncpa [#allocation6], 0 }
   0x2   :  { %12 = vsyncpa [#allocation4], 0  ;;  %s32_s17 = sshll.u32 %s466_s1, 4  ;;  %s33_s17 = int_to_ptr.hbm [resolvable:$true] %s32_s17 }
   0x3   :  { %13 = vsyncpa [#allocation10], 0  ;;  %s400_s18 = smov [#allocation5]   ;;  %s18_s22 = sshll.u32 %s465_s0, 4  ;;  %s19_s22 = int_to_ptr.hbm [resolvable:$true] %s18_s22 }
   0x4   :  { %s34_s19 = sshll.u32 %s400_s18, 4  ;;  %s401_s23 = smov [#allocation2]   ;;  %s35_s19 = int_to_ptr.vmem [resolvable:$true] %s34_s19 }
   0x5   :  { %37 = dma.hbm_to_vmem [thread:$0]  %s33_s17, 128, %s35_s19, [#allocation6]  }
   0x6   :  { %s20_s24 = sshll.u32 %s401_s23, 4  ;;  %s402_s25 = smov 128   ;;  %s21_s24 = int_to_ptr.vmem [resolvable:$true] %s20_s24 }
   0x7   :  { %s403_s26 = smov 8   ;;  %s42_s28 = sshll.u32 %s467_s2, 4  ;;  %s43_s28 = int_to_ptr.hbm [resolvable:$true] %s42_s28 }
   0x8   :  { %26 = dma.hbm_to_vmem [thread:$0]  %s19_s22, 256, %s21_s24, [#allocation3], %s402_s25, %s402_s25, %s403_s26  }
   0x9   :  { %s404_s29 = smov [#allocation7]  }
   0xa   :  { %s44_s30 = sshll.u32 %s404_s29, 4  ;;  %s45_s30 = int_to_ptr.vmem [resolvable:$true] %s44_s30 }
   0xb   :  { %50 = dma.hbm_to_vmem [thread:$0]  %s43_s28, 2816, %s45_s30, [#allocation6], %s402_s25, %s402_s25, %s403_s26  }
   0xc   :  { %392 = dma.done.wait [#allocation3], 256  }
   0xd   :  { %393 = vsyncadd [#allocation3], 4294967040 }
   0xe   :  { %394 = dma.done.wait [#allocation6], 2944  }
   0xf   :  { %395 = vsyncadd [#allocation6], 4294964352  ;;  %v69_v0 = vld [vmem:[#allocation7 + $0x18] sm:$0xff]  ;;  %v68_v1 = vld [vmem:[#allocation7 + $0x10] sm:$0xff]  ;;  %vm88_vm0 = vcmask 261120   ;;  %vm121_vm1 = vcmask 1042432  }
  0x10   :  { %107 = vmatpush.msra.mxu0 %v69_v0  ;;  %v67_v2 = vld [vmem:[#allocation7 + $0x8] sm:$0xff]  ;;  %v86_v3 = vld [vmem:[#allocation7 + $0xa0] sm:$0xff]  ;;  %v85_v4 = vld [vmem:[#allocation7 + $0x98] sm:$0xff]  ;;  %vm133_vm2 = vcmask 1046528   ;;  %vm144_vm3 = vcmask 1045504   ;;  %s405_s0 = smov [#allocation9]  }
  0x11   :  { %179 = vmatpush.msra.mxu1 %v86_v3  ;;  %v66_v5 = vld [vmem:[#allocation7] sm:$0xff]  ;;  %v84_v6 = vld [vmem:[#allocation7 + $0x90] sm:$0xff]  ;;  %248 = vmatpush.msra.mxu2 %v86_v3  ;;  %v63_v7 = vld [vmem:[#allocation2] sm:$0xff]  ;;  %s228_s2 = sshll.u32 %s405_s0, 4  ;;  %s230_s7 = sshll.u32 %s469_s4, 4  ;;  %s229_s2 = int_to_ptr.vmem [resolvable:$true] %s228_s2  ;;  %s231_s7 = int_to_ptr.hbm [resolvable:$true] %s230_s7 }
  0x12   :  { %108 = vmatpush.msra.mxu0 %v68_v1  ;;  %v83_v8 = vld [vmem:[#allocation7 + $0x88] sm:$0xff]  ;;  %v82_v9 = vld [vmem:[#allocation7 + $0x80] sm:$0xff]  ;;  %v81_v10 = vld [vmem:[#allocation7 + $0x78] sm:$0xff]  ;;  %s406_s8 = smov [#allocation8]   ;;  %s216_s12 = sshll.u32 %s468_s3, 4  ;;  %s217_s12 = int_to_ptr.hbm [resolvable:$true] %s216_s12 }
  0x13   :  { %180 = vmatpush.msra.mxu1 %v85_v4  ;;  %249 = vmatpush.msra.mxu2 %v85_v4  ;;  %v80_v11 = vld [vmem:[#allocation7 + $0x70] sm:$0xff]  ;;  %v79_v13 = vld [vmem:[#allocation7 + $0x68] sm:$0xff]  ;;  %v78_v14 = vld [vmem:[#allocation7 + $0x60] sm:$0xff]  ;;  %s214_s9 = sshll.u32 %s406_s8, 4  ;;  %s215_s9 = int_to_ptr.vmem [resolvable:$true] %s214_s9 }
  0x14   :  { %109 = vmatpush.msra.mxu0 %v67_v2  ;;  %v64_v12 = vld [vmem:[#allocation2 + $0x8] sm:$0xff]  ;;  %v77_v15 = vld [vmem:[#allocation7 + $0x58] sm:$0xff]  ;;  %v75_v17 = vld [vmem:[#allocation7 + $0x48] sm:$0xff] }
  0x15   :  { %181 = vmatpush.msra.mxu1 %v84_v6  ;;  %250 = vmatpush.msra.mxu2 %v84_v6  ;;  %v76_v16 = vld [vmem:[#allocation7 + $0x50] sm:$0xff]  ;;  %v74_v18 = vld [vmem:[#allocation7 + $0x40] sm:$0xff]  ;;  %v73_v19 = vld [vmem:[#allocation7 + $0x38] sm:$0xff] }
  0x16   :  { %110 = vmatpush.msra.mxu0 %v66_v5  ;;  %v72_v20 = vld [vmem:[#allocation7 + $0x30] sm:$0xff]  ;;  %v71_v21 = vld [vmem:[#allocation7 + $0x28] sm:$0xff]  ;;  %v70_v22 = vld [vmem:[#allocation7 + $0x20] sm:$0xff] }
  0x17   :  { %246 = vmatmul.msk.f32.vlgmr.msra.gmra.mxu0 %vm88_vm0, %v63_v7  ;;  %182 = vmatpush.msra.mxu1 %v83_v8  ;;  %v128_v23 = vperm.slane %v70_v22, 1  ;;  %v139_v24 = vperm.slane %v70_v22, 2  ;;  %v65_v25 = vld [vmem:[#allocation5] sm:$0x3f]  ;;  %v123_v27 = vperm.slane %v70_v22, 3  ;;  %v125_v28 = vperm.slane %v70_v22, 0 }
  0x18   :  { %251 = vmatpush.msra.mxu2 %v83_v8  ;;  %v151_v42 = vrot.slane %v65_v25, 3  ;;  %v271_v3 = vld [vmem:[#allocation7 + $0xa8] ss:$0 sm:$0xff] }
  0x19   :  { %183 = vmatpush.msra.mxu1 %v82_v9 }
  0x1a   :  { %252 = vmatpush.msra.mxu2 %v82_v9 }
  0x1b   :  { %184 = vmatpush.msra.mxu1 %v81_v10 }
  0x1c   :  { %253 = vmatpush.msra.mxu2 %v81_v10 }
  0x1d   :  { %185 = vmatpush.msra.mxu1 %v80_v11 }
  0x1e   :  { %254 = vmatpush.msra.mxu2 %v80_v11 }
  0x1f   :  { %247 = vmatmul.msk.f32.gmra.mxu0 %vm88_vm0, %v64_v12  ;;  %186 = vmatpush.msra.mxu1 %v79_v13 }
  0x20   :  { %255 = vmatpush.msra.mxu2 %v79_v13 }
  0x21   :  { %187 = vmatpush.msra.mxu1 %v78_v14 }
  0x22   :  { %256 = vmatpush.msra.mxu2 %v78_v14 }
  0x23   :  { %188 = vmatpush.msra.mxu1 %v77_v15 }
  0x24   :  { %257 = vmatpush.msra.mxu2 %v77_v15 }
  0x25   :  { %189 = vmatpush.msra.mxu1 %v76_v16 }
  0x26   :  { %258 = vmatpush.msra.mxu2 %v76_v16 }
  0x27   :  { %190 = vmatpush.msra.mxu1 %v75_v17 }
  0x28   :  { %259 = vmatpush.msra.mxu2 %v75_v17 }
  0x29   :  { %191 = vmatpush.msra.mxu1 %v74_v18 }
  0x2a   :  { %260 = vmatpush.msra.mxu2 %v74_v18 }
  0x2b   :  { %192 = vmatpush.msra.mxu1 %v73_v19 }
  0x2c   :  { %261 = vmatpush.msra.mxu2 %v73_v19 }
  0x2d   :  { %193 = vmatpush.msra.mxu1 %v72_v20 }
  0x2e   :  { %262 = vmatpush.msra.mxu2 %v72_v20 }
  0x2f   :  { %194 = vmatpush.msra.mxu1 %v71_v21 }
  0x30   :  { %263 = vmatpush.msra.mxu2 %v71_v21 }
  0x94   :  { %v112_v26 = vpop.f32.mrf.mxu0 }
  0x95   :  { %v119_v29 = vrot.slane %v112_v26, 5  ;;  %v124_v33 = vmul.f32 %v123_v27, %v112_v26 }
  0x97   :  { %v122_v30 = vsel %vm121_vm1, %v65_v25, %v119_v29  ;;  %v130_v31 = vmul.f32 %v128_v23, %v119_v29  ;;  %v141_v32 = vmul.f32 %v139_v24, %v119_v29 }
  0x98   :  { %v126_v34 = vmul.f32 %v125_v28, %v122_v30  ;;  %v129_v35 = vmul.f32 %v128_v23, %v122_v30  ;;  %v140_v36 = vmul.f32 %v139_v24, %v122_v30 }
  0x99   :  { %v135_v37 = vrot.slane %v130_v31, 1  ;;  %v146_v41 = vrot.slane %v141_v32, 2 }
  0x9a   :  { %v127_v38 = vadd.f32 %v126_v34, %v124_v33  ;;  %v134_v39 = vrot.slane %v129_v35, 1  ;;  %v145_v40 = vrot.slane %v140_v36, 2 }
  0x9c   :  { %v115_v43 = vpop.f32.mrf.mxu0  ;;  %v136_v44 = vsel %vm133_vm2, %v134_v39, %v135_v37  ;;  %v147_v48 = vsel %vm144_vm3, %v145_v40, %v146_v41 }
  0x9d   :  { %v154_v45 = vrot.slane %v115_v43, 5  ;;  %v138_v46 = vadd.f32 %v136_v44, %v127_v38  ;;  %v157_v47 = vmul.f32 %v123_v27, %v115_v43 }
  0x9f   :  { %v156_v49 = vsel %vm121_vm1, %v151_v42, %v154_v45  ;;  %v161_v50 = vmul.f32 %v154_v45, %v128_v23  ;;  %v206_v51 = vrot.slane %v154_v45, 5  ;;  %v149_v52 = vadd.f32 %v147_v48, %v138_v46 }
  0xa0   :  { %v158_v53 = vmul.f32 %v156_v49, %v125_v28  ;;  %v160_v54 = vmul.f32 %v156_v49, %v128_v23  ;;  %v169_v55 = vmul.f32 %v156_v49, %v139_v24  ;;  %v170_v56 = vmul.f32 %v154_v45, %v139_v24 }
  0xa1   :  { %195 = vmatmul.f32.vlgmr.msra.gmra.mxu1 %v149_v52  ;;  %v165_v57 = vrot.slane %v161_v50, 1  ;;  %v208_v58 = vsel %vm121_vm1, %v119_v29, %v206_v51 }
  0xa2   :  { %v159_v59 = vadd.f32 %v158_v53, %v157_v47  ;;  %v164_v60 = vrot.slane %v160_v54, 1  ;;  %v173_v61 = vrot.slane %v169_v55, 2  ;;  %v174_v62 = vrot.slane %v170_v56, 2  ;;  %209 = vst [vmem:[#allocation9] sm:$0x3f] %v208_v58 }
  0xa3   :  { %233 = dma.vmem_to_hbm [thread:$0]  %s229_s2, 128, %s231_s7, [#allocation10]  }
  0xa4   :  { %v166_v63 = vsel %vm133_vm2, %v164_v60, %v165_v57  ;;  %v175_v1 = vsel %vm144_vm3, %v173_v61, %v174_v62 }
  0xa5   :  { %v168_v0 = vadd.f32 %v166_v63, %v159_v59 }
  0xa7   :  { %v177_v2 = vadd.f32 %v175_v1, %v168_v0 }
  0xa9   :  { %198 = vmatmul.f32.vlgmr.msra.gmra.mxu2 %v177_v2 }
 0x11e   :  { %v196_v4 = vpop.f32.mrf.mxu1 }
 0x11f   :  { %v197_v5 = vadd.f32 %v271_v3, %v196_v4 }
 0x121   :  { %v202_v6 = vmax.f32 %v197_v5, 0.0 }
 0x123   :  { %204 = vst [vmem:[#allocation8] sm:$0xff] %v202_v6 }
 0x12c   :  { %v199_v7 = vpop.f32.mrf.mxu2 }
 0x12d   :  { %v200_v8 = vadd.f32 %v271_v3, %v199_v7 }
 0x12f   :  { %v203_v9 = vmax.f32 %v200_v8, 0.0 }
 0x131   :  { %205 = vst [vmem:[#allocation8 + $0x8] sm:$0xff] %v203_v9 }
 0x132   :  { %222 = dma.vmem_to_hbm [thread:$0]  %s215_s9, 256, %s217_s12, [#allocation4], %s402_s25, %s402_s25, %s403_s26  }
 0x133   :  { %396 = dma.done.wait [#allocation4], 256  }
 0x134   :  { %397 = vsyncadd [#allocation4], 4294967040 }
 0x135   :  { %398 = dma.done.wait [#allocation10], 128  }
 0x136   :  { %399 = vsyncadd [#allocation10], 4294967168 }
 0x137   :  { %242 = vsyncpa [#allocation3], 1 }
 0x138   :  { %243 = vsyncpa [#allocation6], 1 }
 0x139   :  { %244 = vsyncpa [#allocation4], 1 }
 0x13a   :  { %245 = vsyncpa [#allocation10], 1 }

</bundles_post_ra>
